<compile_context>
chip_gen: v5e
topology: v5e:2x2
jax: 0.10.0
libtpu: 0.0.40
codegen_flags: <defaults>
</compile_context>

<pallas_src>
import jax
import jax.numpy as jnp
from jax.experimental import pallas as pl
from jax.experimental.pallas import tpu as pltpu


def hier_atten_kernel(x_ref, w1_ref, b1_ref, w2_ref, out_ref):
    TB, S, D = x_ref.shape
    A = w1_ref.shape[1]

    x = x_ref[...]                                    # (TB, S, D), native dtype

    # MLP_linear + tanh. Flattened so the MXU sees M = TB*S rows; accumulate in
    # f32 via preferred_element_type. Native-dtype operands feed the MXU.
    h = jnp.tanh(
        jnp.dot(x.reshape(TB * S, D), w1_ref[...],
                preferred_element_type=jnp.float32)
        + b1_ref[...].astype(jnp.float32)
    )                                                 # (TB*S, A) f32

    # context_vector: VPU multiply + lane reduction (no M=1 / N=1 MXU op).
    w2_row = w2_ref[...].astype(jnp.float32).reshape(1, 1, A)
    logits = jnp.sum(h.reshape(TB, S, A) * w2_row, axis=-1)   # (TB, S) f32

    # Softmax over the sequence axis (PyTorch Softmax(dim=1)), exact divide.
    m = jnp.max(logits, axis=-1, keepdims=True)
    e = jnp.exp(logits - m)
    score = e / jnp.sum(e, axis=-1, keepdims=True)            # (TB, S) f32

    # att_out = sum_s score * x : VPU broadcast-multiply + sublane reduce over S
    # (S is small, so this beats TB independent M=1 matmuls and is exact).
    x_f32 = x.astype(jnp.float32)                     # no-op for f32 inputs
    att = jnp.sum(x_f32 * score.reshape(TB, S, 1), axis=1)    # (TB, D) f32
    out_ref[...] = att.astype(out_ref.dtype)


def _vmem_budget_bytes():
    """~50% of this generation's VMEM (v5e/v6e: 128 MiB, v7x: 64 MiB per TC)."""
    cap = 64 * 1024 * 1024  # conservative fallback = v7x per-TC capacity
    try:
        info = pltpu.get_tpu_info()
        cap = int(getattr(info, "vmem_capacity_bytes", cap))
    except Exception:
        pass
    return max(cap // 2, 16 * 1024 * 1024)


def _per_batch_vmem_bytes(S, D, A, itemsize):
    """VMEM bytes needed per batch row inside one grid step."""
    return (2 * S * D * itemsize    # double-buffered x tile
            + 2 * D * itemsize      # double-buffered output tile
            + S * A * 4             # h (tanh activations, f32)
            + 2 * S * D * 4         # f32 copy + weighted product for the sum
            + 8 * S * 4)            # logits / exp / score / reduction temps


def _pick_block_b(B, S, D, A, itemsize, budget_bytes):
    """Largest batch tile that fits the VMEM budget (maximizes MXU M-fill),
    rounded to the f32 sublane pack. No forced split: a single grid step is
    cheapest on single-TC chips when the whole batch fits."""
    per_b = max(1, _per_batch_vmem_bytes(S, D, A, itemsize))
    weights = (D * A + 2 * A) * 4
    avail = max(budget_bytes - weights, per_b)
    tb = max(1, min(B, avail // per_b))
    if tb >= 8:
        tb = (tb // 8) * 8          # sublane-aligned tiles / stores
    return int(min(tb, B))


def hier_atten(x, w1, b1, w2, *, block_b=None):
    """x: (B, S, D); w1: (D, A); b1: (1, A); w2: (A, 1) -> (B, D)."""
    B, S, D = x.shape
    A = w1.shape[1]
    itemsize = jnp.dtype(x.dtype).itemsize

    budget = _vmem_budget_bytes()
    if block_b is None:
        block_b = _pick_block_b(B, S, D, A, itemsize, budget)
    block_b = int(min(block_b, B))
    grid = (pl.cdiv(B, block_b),)

    w2_row = w2.reshape(1, A)  # context vector as a lane-dense row

    needed = ((D * A + 2 * A) * 4
              + block_b * _per_batch_vmem_bytes(S, D, A, itemsize))
    vmem_limit = int(min(budget, max(2 * needed, 32 * 1024 * 1024)))

    return pl.pallas_call(
        hier_atten_kernel,
        out_shape=jax.ShapeDtypeStruct((B, D), x.dtype),
        grid=grid,
        in_specs=[
            pl.BlockSpec((block_b, S, D), lambda i: (i, 0, 0)),  # batch tile of x
            pl.BlockSpec((D, A), lambda i: (0, 0)),              # W1 (resident)
            pl.BlockSpec((1, A), lambda i: (0, 0)),              # b1 (resident)
            pl.BlockSpec((1, A), lambda i: (0, 0)),              # w2 row (resident)
        ],
        out_specs=pl.BlockSpec((block_b, D), lambda i: (i, 0)),
        compiler_params=pltpu.CompilerParams(
            dimension_semantics=("parallel",),   # batch tiles are independent
            vmem_limit_bytes=vmem_limit,
        ),
    )(x, w1, b1, w2_row)


def hier_atten_ref(x, w1, b1, w2):
    """Pure-JAX reference mirroring the PyTorch forward (HIGHEST precision)."""
    hp = jax.lax.Precision.HIGHEST
    mlp_out = jnp.tanh(jnp.einsum("bsd,da->bsa", x, w1, precision=hp) + b1[0])
    logits = jnp.einsum("bsa,ao->bso", mlp_out, w2, precision=hp)   # (B, S, 1)
    score = jax.nn.softmax(logits, axis=1)
    return jnp.sum(x * score, axis=1)


if __name__ == "__main__":
    # Small shapes consistent with the module: batch=16, seq=8, in_size=32,
    # attention_size=16.
    B, S, D, A = 16, 8, 32, 16

    key = jax.random.PRNGKey(0)
    kx, kw1, kb1, kw2 = jax.random.split(key, 4)

    x = jax.random.normal(kx, (B, S, D), dtype=jnp.float32)
    # Deterministic synthetic parameters (stand-in for init_linear_weight_bias).
    w1 = jax.random.normal(kw1, (D, A), dtype=jnp.float32) * 0.1
    b1 = jax.random.normal(kb1, (1, A), dtype=jnp.float32) * 0.01
    w2 = jax.random.normal(kw2, (A, 1), dtype=jnp.float32) * 0.1

    out = jax.block_until_ready(hier_atten(x, w1, b1, w2))
    ref = hier_atten_ref(x, w1, b1, w2)

    assert out.shape == (B, D), out.shape
    # Only remaining approximate op is the in-kernel MXU matmul at default
    # precision (reference runs at HIGHEST); 5e-3 comfortably covers it.
    max_err = float(jnp.max(jnp.abs(out - ref)))
    assert jnp.allclose(out, ref, atol=5e-3, rtol=5e-3), (
        f"mismatch vs reference (max |err| = {max_err})")

    # TODO(synk): nn.Dropout(p=0.0) is an identity in this forward; omitted.
    print("KERNEL_OK")
</pallas_src>

<mosaic_0001>
module attributes {stable_mosaic.version = 11 : i64} {
  func.func @hier_atten_kernel(%arg0: i32, %arg1: memref<16x8x32xf32, #tpu.memory_space<vmem>>, %arg2: memref<32x16xf32, #tpu.memory_space<vmem>>, %arg3: memref<1x16xf32, #tpu.memory_space<vmem>>, %arg4: memref<1x16xf32, #tpu.memory_space<vmem>>, %arg5: memref<16x32xf32, #tpu.memory_space<vmem>>) attributes {dimension_semantics = [#tpu.dimension_semantics<parallel>], iteration_bounds = array<i64: 1>, scalar_prefetch = 0 : i64, scratch_operands = 0 : i64, tpu.core_type = #tpu.core_type<tc>, window_params = [{transform_indices = @transform_0, window_bounds = array<i64: 16, 8, 32>}, {pipeline_mode = #tpu.pipeline_mode<synchronous>, transform_indices = @transform_1, window_bounds = array<i64: 32, 16>}, {pipeline_mode = #tpu.pipeline_mode<synchronous>, transform_indices = @transform_2, window_bounds = array<i64: 1, 16>}, {pipeline_mode = #tpu.pipeline_mode<synchronous>, transform_indices = @transform_3, window_bounds = array<i64: 1, 16>}, {transform_indices = @transform_4, window_bounds = array<i64: 16, 32>}]} {
    %c0 = arith.constant 0 : index
    %c0_0 = arith.constant 0 : index
    %c0_1 = arith.constant 0 : index
    %0 = vector.load %arg1[%c0, %c0_0, %c0_1] : memref<16x8x32xf32, #tpu.memory_space<vmem>>, vector<16x8x32xf32>
    %1 = vector.shape_cast %0 : vector<16x8x32xf32> to vector<128x32xf32>
    %c0_2 = arith.constant 0 : index
    %c0_3 = arith.constant 0 : index
    %2 = vector.load %arg2[%c0_2, %c0_3] : memref<32x16xf32, #tpu.memory_space<vmem>>, vector<32x16xf32>
    %cst = arith.constant dense<0.000000e+00> : vector<128x16xf32>
    %3 = tpu.matmul %1, %2, %cst {dimension_numbers = #tpu.dot_dimension_numbers<[1], [0], [0], [1], [0, 0, 1, 1], [], []>} : vector<128x32xf32>, vector<32x16xf32>, vector<128x16xf32> -> vector<128x16xf32>
    %c0_4 = arith.constant 0 : index
    %c0_5 = arith.constant 0 : index
    %4 = vector.load %arg3[%c0_4, %c0_5] : memref<1x16xf32, #tpu.memory_space<vmem>>, vector<1x16xf32>
    %5 = vector.broadcast %4 : vector<1x16xf32> to vector<128x16xf32>
    %6 = arith.addf %3, %5 : vector<128x16xf32>
    %7 = math.tanh %6 : vector<128x16xf32>
    %c0_6 = arith.constant 0 : index
    %c0_7 = arith.constant 0 : index
    %8 = vector.load %arg4[%c0_6, %c0_7] : memref<1x16xf32, #tpu.memory_space<vmem>>, vector<1x16xf32>
    %9 = vector.shape_cast %8 : vector<1x16xf32> to vector<1x1x16xf32>
    %10 = vector.shape_cast %7 : vector<128x16xf32> to vector<16x8x16xf32>
    %11 = vector.broadcast %9 : vector<1x1x16xf32> to vector<16x8x16xf32>
    %12 = arith.mulf %10, %11 : vector<16x8x16xf32>
    %cst_8 = arith.constant dense<0.000000e+00> : vector<16x8xf32>
    %13 = vector.multi_reduction <add>, %12, %cst_8 [2] : vector<16x8x16xf32> to vector<16x8xf32>
    %cst_9 = arith.constant dense<0xFF800000> : vector<16xf32>
    %14 = vector.multi_reduction <maximumf>, %13, %cst_9 [1] : vector<16x8xf32> to vector<16xf32>
    %15 = vector.shape_cast %14 : vector<16xf32> to vector<16x1xf32>
    %16 = vector.broadcast %15 : vector<16x1xf32> to vector<16x8xf32>
    %17 = arith.subf %13, %16 : vector<16x8xf32>
    %18 = math.exp %17 : vector<16x8xf32>
    %cst_10 = arith.constant dense<0.000000e+00> : vector<16xf32>
    %19 = vector.multi_reduction <add>, %18, %cst_10 [1] : vector<16x8xf32> to vector<16xf32>
    %20 = vector.shape_cast %19 : vector<16xf32> to vector<16x1xf32>
    %21 = vector.broadcast %20 : vector<16x1xf32> to vector<16x8xf32>
    %22 = arith.divf %18, %21 : vector<16x8xf32>
    %23 = vector.shape_cast %22 : vector<16x8xf32> to vector<16x8x1xf32>
    %24 = vector.broadcast %23 : vector<16x8x1xf32> to vector<16x8x32xf32>
    %25 = arith.mulf %0, %24 : vector<16x8x32xf32>
    %cst_11 = arith.constant dense<0.000000e+00> : vector<16x32xf32>
    %26 = vector.multi_reduction <add>, %25, %cst_11 [1] : vector<16x8x32xf32> to vector<16x32xf32>
    %c0_12 = arith.constant 0 : index
    %c0_13 = arith.constant 0 : index
    %27 = vector.load %arg5[%c0_12, %c0_13] : memref<16x32xf32, #tpu.memory_space<vmem>>, vector<16x32xf32>
    tpu.vector_store %arg5[%c0_12, %c0_13], %26 {strides = array<i32>} : memref<16x32xf32, #tpu.memory_space<vmem>>, vector<16x32xf32>,
    return
  }
  func.func @transform_0(%arg0: i32) -> (i32, i32, i32) {
    %c0_i32 = arith.constant 0 : i32
    %c0_i32_0 = arith.constant 0 : i32
    %c0_i32_1 = arith.constant 0 : i32
    return %arg0, %c0_i32, %c0_i32_0 : i32, i32, i32
  }
  func.func @transform_1(%arg0: i32) -> (i32, i32) {
    %c0_i32 = arith.constant 0 : i32
    %c0_i32_0 = arith.constant 0 : i32
    %c0_i32_1 = arith.constant 0 : i32
    return %c0_i32, %c0_i32_0 : i32, i32
  }
  func.func @transform_2(%arg0: i32) -> (i32, i32) {
    %c0_i32 = arith.constant 0 : i32
    %c0_i32_0 = arith.constant 0 : i32
    %c0_i32_1 = arith.constant 0 : i32
    return %c0_i32, %c0_i32_0 : i32, i32
  }
  func.func @transform_3(%arg0: i32) -> (i32, i32) {
    %c0_i32 = arith.constant 0 : i32
    %c0_i32_0 = arith.constant 0 : i32
    %c0_i32_1 = arith.constant 0 : i32
    return %c0_i32, %c0_i32_0 : i32, i32
  }
  func.func @transform_4(%arg0: i32) -> (i32, i32) {
    %c0_i32 = arith.constant 0 : i32
    %c0_i32_0 = arith.constant 0 : i32
    return %arg0, %c0_i32 : i32, i32
  }
}

</mosaic_0001>

<bundles_post_ra>
// kernel: tpu_custom_call.1
= control target key start
LH: loop header
LB: loop body
LE: loop exit
PB: predicated region body
PF: predicated region fallthrough
CT: control target
= control target key end

     0   :  { %9 = vsyncpa [#allocation3], 0  ;;  %s1847_s0 = inlined_call_operand.hbm [shape: f32[16,8,32], index: 0, kind: input, shape index: {}]   ;;  %s1848_s1 = inlined_call_operand.vmem [shape: f32[32,16], index: 1, kind: input, shape index: {}]   ;;  %s1849_s2 = inlined_call_operand.vmem [shape: f32[1,16], index: 2, kind: input, shape index: {}]   ;;  %s1850_s3 = inlined_call_operand.vmem [shape: f32[1,16], index: 3, kind: input, shape index: {}]   ;;  %s1851_s4 = inlined_call_operand.hbm [shape: f32[16,32], index: 4, kind: output, shape index: {}]  }
   0x1   :  { %10 = vsyncpa [#allocation4], 0  ;;  %s15_s17 = sshll.u32 %s1847_s0, 4  ;;  %s1242_s18 = smov [#allocation2]   ;;  %s16_s17 = int_to_ptr.hbm [resolvable:$true] %s15_s17 }
   0x2   :  { %s17_s19 = sshll.u32 %s1242_s18, 4  ;;  %s1243_s20 = smov 128   ;;  %s18_s19 = int_to_ptr.vmem [resolvable:$true] %s17_s19 }
   0x3   :  { %s1244_s21 = smov 8  }
   0x4   :  { %23 = dma.hbm_to_vmem [thread:$0]  %s16_s17, 2048, %s18_s19, [#allocation3], %s1243_s20, %s1243_s20, %s1244_s21  }
   0x5   :  { %1238 = dma.done.wait [#allocation3], 2048  }
   0x6   :  { %1239 = vsyncadd [#allocation3], 4294965248  ;;  %v53_v0 = vld [vmem:[%s1848_s1 + $0x18] sm:$0xff]  ;;  %v52_v1 = vld [vmem:[%s1848_s1 + $0x10] sm:$0xff]  ;;  %vm58_vm0 = vcmask 261120   ;;  %vm208_vm1 = vcmask 130048  }
   0x7   :  { %119 = vmatpush.msra.mxu0 %v53_v0  ;;  %1057 = vmatpush.msra.mxu2 %v53_v0  ;;  %v51_v2 = vld [vmem:[%s1848_s1 + $0x8] sm:$0xff]  ;;  %v50_v3 = vld [vmem:[%s1848_s1] sm:$0xff]  ;;  %v36_v12 = vld [vmem:[#allocation2 + $0x10] sm:$0xff]  ;;  %vm291_vm2 = vcmask 1041409   ;;  %vm293_vm3 = vcmask 1042434   ;;  %vm295_vm4 = vcmask 1043459  }
   0x8   :  { %1058 = vmatpush.msra.mxu3 %v53_v0  ;;  %1056 = vmatpush.msra.mxu1 %v53_v0  ;;  %v34_v4 = vld [vmem:[#allocation2] sm:$0xff]  ;;  %v35_v8 = vld [vmem:[#allocation2 + $0x8] sm:$0xff]  ;;  %v44_v13 = vld [vmem:[#allocation2 + $0x50] sm:$0xff]  ;;  %vm297_vm5 = vcmask 1044484   ;;  %vm1854_vm6 = vcmask 1045509   ;;  %vm1853_vm7 = vcmask 1046534  }
   0x9   :  { %120 = vmatpush.msra.mxu0 %v52_v1  ;;  %1060 = vmatpush.msra.mxu2 %v52_v1  ;;  %v42_v5 = vld [vmem:[#allocation2 + $0x40] sm:$0xff]  ;;  %v43_v9 = vld [vmem:[#allocation2 + $0x48] sm:$0xff]  ;;  %v48_v14 = vld [vmem:[#allocation2 + $0x70] sm:$0xff]  ;;  %vm1852_vm8 = vcmask 1047559   ;;  %vm314_vm9 = vcmask 64512   ;;  %s1027_s8 = sshll.u32 %s1851_s4, 4  ;;  %s1028_s8 = int_to_ptr.hbm [resolvable:$true] %s1027_s8 }
   0xa   :  { %1061 = vmatpush.msra.mxu3 %v52_v1  ;;  %1059 = vmatpush.msra.mxu1 %v52_v1  ;;  %v46_v6 = vld [vmem:[#allocation2 + $0x60] sm:$0xff]  ;;  %v47_v10 = vld [vmem:[#allocation2 + $0x68] sm:$0xff]  ;;  %v40_v15 = vld [vmem:[#allocation2 + $0x30] sm:$0xff] }
   0xb   :  { %121 = vmatpush.msra.mxu0 %v51_v2  ;;  %1063 = vmatpush.msra.mxu2 %v51_v2  ;;  %v38_v7 = vld [vmem:[#allocation2 + $0x20] sm:$0xff]  ;;  %v39_v11 = vld [vmem:[#allocation2 + $0x28] sm:$0xff]  ;;  %v37_v16 = vld [vmem:[#allocation2 + $0x18] sm:$0xff] }
   0xc   :  { %1064 = vmatpush.msra.mxu3 %v51_v2  ;;  %1062 = vmatpush.msra.mxu1 %v51_v2  ;;  %v45_v17 = vld [vmem:[#allocation2 + $0x58] sm:$0xff]  ;;  %v1309_v20 = vld [vmem:[%s1849_s2] ss:$0 sm:$0xff]  ;;  %s1246_s2 = smov [#allocation5]  }
   0xd   :  { %122 = vmatpush.msra.mxu0 %v50_v3  ;;  %1066 = vmatpush.msra.mxu2 %v50_v3  ;;  %v49_v18 = vld [vmem:[#allocation2 + $0x78] sm:$0xff]  ;;  %v1316_v25 = vld [vmem:[%s1850_s3] ss:$0 sm:$0xff]  ;;  %s1025_s3 = sshll.u32 %s1246_s2, 4  ;;  %s1026_s3 = int_to_ptr.vmem [resolvable:$true] %s1025_s3 }
   0xe   :  { %1067 = vmatpush.msra.mxu3 %v50_v3  ;;  %1040 = vmatmul.msk.f32.vlgmr.msra.gmra.mxu0 %vm58_vm0, %v34_v4  ;;  %v41_v19 = vld [vmem:[#allocation2 + $0x38] sm:$0xff] }
   0xf   :  { %1048 = vmatmul.msk.f32.vlgmr.msra.gmra.mxu2 %vm58_vm0, %v42_v5  ;;  %1052 = vmatmul.msk.f32.vlgmr.msra.gmra.mxu3 %vm58_vm0, %v46_v6 }
  0x10   :  { %1065 = vmatpush.msra.mxu1 %v50_v3 }
  0x11   :  { %1044 = vmatmul.msk.f32.vlgmr.msra.gmra.mxu1 %vm58_vm0, %v38_v7 }
  0x16   :  { %1041 = vmatmul.msk.f32.gmra.mxu0 %vm58_vm0, %v35_v8 }
  0x17   :  { %1049 = vmatmul.msk.f32.gmra.mxu2 %vm58_vm0, %v43_v9  ;;  %1053 = vmatmul.msk.f32.gmra.mxu3 %vm58_vm0, %v47_v10 }
  0x19   :  { %1045 = vmatmul.msk.f32.gmra.mxu1 %vm58_vm0, %v39_v11 }
  0x1e   :  { %1042 = vmatmul.msk.f32.gmra.mxu0 %vm58_vm0, %v36_v12 }
  0x1f   :  { %1050 = vmatmul.msk.f32.gmra.mxu2 %vm58_vm0, %v44_v13  ;;  %1054 = vmatmul.msk.f32.gmra.mxu3 %vm58_vm0, %v48_v14 }
  0x21   :  { %1046 = vmatmul.msk.f32.gmra.mxu1 %vm58_vm0, %v40_v15 }
  0x26   :  { %1043 = vmatmul.msk.f32.gmra.mxu0 %vm58_vm0, %v37_v16 }
  0x27   :  { %1051 = vmatmul.msk.f32.gmra.mxu2 %vm58_vm0, %v45_v17  ;;  %1055 = vmatmul.msk.f32.gmra.mxu3 %vm58_vm0, %v49_v18 }
  0x29   :  { %1047 = vmatmul.msk.f32.gmra.mxu1 %vm58_vm0, %v41_v19 }
  0x8b   :  { %v124_v21 = vpop.f32.mrf.mxu0 }
  0x8c   :  { %v125_v22 = vadd.f32 %v1309_v20, %v124_v21 }
  0x8e   :  { %1078 = vtanh.f32 %v125_v22  ;;  %v136_v23 = vpop.f32.mrf.mxu1 }
  0x8f   :  { %v137_v24 = vadd.f32 %v1309_v20, %v136_v23 }
  0x91   :  { %1080 = vtanh.f32 %v137_v24 }
  0x92   :  { %v148_v26 = vpop.f32.mrf.mxu2  ;;  %v160_v27 = vpop.f32.mrf.mxu3 }
  0x93   :  { %v149_v28 = vadd.f32 %v1309_v20, %v148_v26  ;;  %v161_v29 = vadd.f32 %v1309_v20, %v160_v27  ;;  %v127_v30 = vpop.f32.mrf.mxu0 }
  0x94   :  { %v1079_v31 = vpop.eup %1078  ;;  %v128_v33 = vadd.f32 %v1309_v20, %v127_v30 }
  0x95   :  { %1082 = vtanh.f32 %v149_v28  ;;  %v192_v32 = vmul.f32 %v1079_v31, %v1316_v25 }
  0x96   :  { %1084 = vtanh.f32 %v161_v29  ;;  %v139_v34 = vpop.f32.mrf.mxu1 }
  0x97   :  { %v1081_v35 = vpop.eup %1080  ;;  %v209_v36 = vsel %vm208_vm1, %v192_v32, 0.0  ;;  %v140_v37 = vadd.f32 %v1309_v20, %v139_v34 }
  0x98   :  { %210 = vadd.xlane.f32.xlu0 %v209_v36  ;;  %v196_v38 = vmul.f32 %v1081_v35, %v1316_v25 }
  0x99   :  { %1086 = vtanh.f32 %v140_v37 }
  0x9a   :  { %1088 = vtanh.f32 %v128_v33  ;;  %v151_v39 = vpop.f32.mrf.mxu2  ;;  %v163_v40 = vpop.f32.mrf.mxu3  ;;  %v221_v41 = vsel %vm208_vm1, %v196_v38, 0.0 }
  0x9b   :  { %v1083_v42 = vpop.eup %1082  ;;  %v152_v43 = vadd.f32 %v1309_v20, %v151_v39  ;;  %v164_v44 = vadd.f32 %v1309_v20, %v163_v40  ;;  %222 = vadd.xlane.f32.xlu2 %v221_v41  ;;  %v130_v45 = vpop.f32.mrf.mxu0 }
  0x9c   :  { %v1085_v46 = vpop.eup %1084  ;;  %v200_v47 = vmul.f32 %v1083_v42, %v1316_v25  ;;  %v131_v48 = vadd.f32 %v1309_v20, %v130_v45  ;;  %v273_v45 = vlaneseq }
  0x9d   :  { %v204_v49 = vmul.f32 %v1085_v46, %v1316_v25  ;;  %1090 = vtanh.f32 %v164_v44 }
  0x9e   :  { %v233_v50 = vsel %vm208_vm1, %v200_v47, 0.0  ;;  %v142_v51 = vpop.f32.mrf.mxu1  ;;  %1092 = vtanh.f32 %v152_v43 }
  0x9f   :  { %v1087_v52 = vpop.eup %1086  ;;  %234 = vadd.xlane.f32.xlu1 %v233_v50  ;;  %v245_v53 = vsel %vm208_vm1, %v204_v49, 0.0  ;;  %v143_v54 = vadd.f32 %v1309_v20, %v142_v51  ;;  %1094 = vtanh.f32 %v131_v48  ;;  %v1380_v49 = vand.u32 127, %v273_v45 }
  0xa0   :  { %v1089_v55 = vpop.eup %1088  ;;  %246 = vadd.xlane.f32.xlu0 %v245_v53  ;;  %v197_v56 = vmul.f32 %v1087_v52, %v1316_v25 }
  0xa1   :  { %1096 = vtanh.f32 %v143_v54  ;;  %v193_v60 = vmul.f32 %v1089_v55, %v1316_v25 }
  0xa2   :  { %v154_v57 = vpop.f32.mrf.mxu2  ;;  %v166_v58 = vpop.f32.mrf.mxu3  ;;  %v224_v63 = vsel %vm208_vm1, %v197_v56, 0.0 }
  0xa3   :  { %v155_v59 = vadd.f32 %v1309_v20, %v154_v57  ;;  %v133_v61 = vpop.f32.mrf.mxu0  ;;  %v1091_v62 = vpop.eup %1090  ;;  %v212_v6 = vsel %vm208_vm1, %v193_v60, 0.0  ;;  %v167_v12 = vadd.f32 %v1309_v20, %v166_v58 }
  0xa4   :  { %v134_v0 = vadd.f32 %v1309_v20, %v133_v61  ;;  %v1093_v1 = vpop.eup %1092  ;;  %v205_v2 = vmul.f32 %v1091_v62, %v1316_v25 }
  0xa5   :  { %v1095_v3 = vpop.eup %1094  ;;  %1098 = vtanh.f32 %v155_v59  ;;  %v201_v7 = vmul.f32 %v1093_v1, %v1316_v25 }
  0xa6   :  { %v248_v5 = vsel %vm208_vm1, %v205_v2, 0.0  ;;  %1100 = vtanh.f32 %v134_v0  ;;  %v145_v8 = vpop.f32.mrf.mxu1  ;;  %v194_v9 = vmul.f32 %v1095_v3, %v1316_v25 }
  0xa7   :  { %v1097_v4 = vpop.eup %1096  ;;  %225 = vadd.xlane.f32.xlu1 %v224_v63  ;;  %249 = vadd.xlane.f32.xlu2 %v248_v5  ;;  %v146_v15 = vadd.f32 %v1309_v20, %v145_v8  ;;  %v236_v16 = vsel %vm208_vm1, %v201_v7, 0.0 }
  0xa8   :  { %213 = vadd.xlane.f32.xlu0 %v212_v6  ;;  %v198_v10 = vmul.f32 %v1097_v4, %v1316_v25  ;;  %v215_v19 = vsel %vm208_vm1, %v194_v9, 0.0 }
  0xaa   :  { %v157_v11 = vpop.f32.mrf.mxu2  ;;  %v169_v13 = vpop.f32.mrf.mxu3  ;;  %v227_v21 = vsel %vm208_vm1, %v198_v10, 0.0 }
  0xab   :  { %v158_v14 = vadd.f32 %v1309_v20, %v157_v11  ;;  %v170_v17 = vadd.f32 %v1309_v20, %v169_v13  ;;  %v1099_v18 = vpop.eup %1098 }
  0xac   :  { %v1101_v22 = vpop.eup %1100  ;;  %v202_v23 = vmul.f32 %v1099_v18, %v1316_v25 }
  0xad   :  { %1102 = vtanh.f32 %v158_v14  ;;  %v195_v24 = vmul.f32 %v1101_v22, %v1316_v25 }
  0xae   :  { %1104 = vtanh.f32 %v167_v12  ;;  %v239_v29 = vsel %vm208_vm1, %v202_v23, 0.0 }
  0xaf   :  { %237 = vadd.xlane.f32.xlu1 %v236_v16  ;;  %1106 = vtanh.f32 %v146_v15  ;;  %216 = vadd.xlane.f32.xlu2 %v215_v19  ;;  %v218_v30 = vsel %vm208_vm1, %v195_v24, 0.0 }
  0xb0   :  { %228 = vadd.xlane.f32.xlu0 %v227_v21  ;;  %1108 = vtanh.f32 %v170_v17 }
  0xb3   :  { %v1103_v26 = vpop.eup %1102 }
  0xb4   :  { %v1105_v27 = vpop.eup %1104  ;;  %v203_v20 = vmul.f32 %v1103_v26, %v1316_v25  ;;  %v1245_v26 = vmov 0  }
  0xb5   :  { %v1107_v28 = vpop.eup %1106  ;;  %v206_v33 = vmul.f32 %v1105_v27, %v1316_v25  ;;  %1075 = vset.pattern.permute.xlu2 %v1245_v26  ;;  %1074 = vset.pattern.permute.xlu1 %v1245_v26 }
  0xb6   :  { %v1109_v31 = vpop.eup %1108  ;;  %v242_v32 = vsel %vm208_vm1, %v203_v20, 0.0  ;;  %v199_v34 = vmul.f32 %v1107_v28, %v1316_v25  ;;  %1073 = vset.pattern.permute.xlu0 %v1245_v26 }
  0xb7   :  { %243 = vadd.xlane.f32.xlu1 %v242_v32  ;;  %240 = vadd.xlane.f32.xlu2 %v239_v29  ;;  %v207_v35 = vmul.f32 %v1109_v31, %v1316_v25  ;;  %v251_v36 = vsel %vm208_vm1, %v206_v33, 0.0 }
  0xb8   :  { %219 = vadd.xlane.f32.xlu0 %v218_v30  ;;  %v230_v37 = vsel %vm208_vm1, %v199_v34, 0.0 }
  0xb9   :  { %v254_v38 = vsel %vm208_vm1, %v207_v35, 0.0 }
  0xbf   :  { %252 = vadd.xlane.f32.xlu1 %v251_v36  ;;  %231 = vadd.xlane.f32.xlu2 %v230_v37 }
  0xc0   :  { %255 = vadd.xlane.f32.xlu0 %v254_v38 }
 0x10b   :  { %v1364_v39 = vpop.xlane.xlu0 %210 }
 0x10c   :  { %v275_v53 = vperm.slane %v1364_v39, %v1380_v49 }
 0x10e   :  { %v1366_v40 = vpop.xlane.xlu2 %222 }
 0x10f   :  { %v279_v62 = vperm.slane %v1366_v40, %v1380_v49 }
 0x112   :  { %v1368_v41 = vpop.xlane.xlu1 %234 }
 0x113   :  { %v1370_v42 = vpop.xlane.xlu0 %246  ;;  %v283_v55 = vperm.slane %v1368_v41, %v1380_v49 }
 0x114   :  { %v287_v3 = vperm.slane %v1370_v42, %v1380_v49 }
 0x11a   :  { %v1372_v43 = vpop.xlane.xlu1 %225  ;;  %v1374_v25 = vpop.xlane.xlu2 %249 }
 0x11b   :  { %v214_v44 = vpop.xlane.xlu0 %213  ;;  %v280_v6 = vperm.slane %v1372_v43, %v1380_v49  ;;  %v288_v8 = vperm.slane %v1374_v25, %v1380_v49 }
 0x11c   :  { %v276_v50 = vperm.slane %v214_v44, %v1380_v49 }
 0x11e   :  { %v292_v59 = vsel %vm291_vm2, %v276_v50, %v275_v53 }
 0x122   :  { %v1376_v46 = vpop.xlane.xlu1 %237  ;;  %v217_v47 = vpop.xlane.xlu2 %216 }
 0x123   :  { %v1378_v48 = vpop.xlane.xlu0 %228  ;;  %v284_v51 = vperm.slane %v1376_v46, %v1380_v49  ;;  %v277_v52 = vperm.slane %v217_v47, %v1380_v49 }
 0x124   :  { %v281_v11 = vperm.slane %v1378_v48, %v1380_v49 }
 0x125   :  { %v305_v63 = vsel %vm291_vm2, %v284_v51, %v283_v55  ;;  %v294_v0 = vsel %vm293_vm3, %v277_v52, %v292_v59 }
 0x12a   :  { %v1388_v54 = vpop.xlane.xlu1 %243  ;;  %v1394_v57 = vpop.xlane.xlu2 %240 }
 0x12b   :  { %v286_v56 = vperm.slane %v1388_v54, %v1380_v49  ;;  %v220_v58 = vpop.xlane.xlu0 %219  ;;  %v285_v60 = vperm.slane %v1394_v57, %v1380_v49 }
 0x12c   :  { %v278_v61 = vperm.slane %v220_v58, %v1380_v49 }
 0x12d   :  { %v306_v1 = vsel %vm293_vm3, %v285_v60, %v305_v63 }
 0x12e   :  { %v296_v2 = vsel %vm295_vm4, %v278_v61, %v294_v0  ;;  %v307_v4 = vsel %vm295_vm4, %v286_v56, %v306_v1 }
 0x12f   :  { %v298_v5 = vsel %vm297_vm5, %v279_v62, %v296_v2  ;;  %v308_v7 = vsel %vm297_vm5, %v287_v3, %v307_v4 }
 0x130   :  { %v300_v10 = vsel %vm1854_vm6, %v280_v6, %v298_v5  ;;  %v309_v17 = vsel %vm1854_vm6, %v288_v8, %v308_v7 }
 0x131   :  { %v302_v18 = vsel %vm1853_vm7, %v281_v11, %v300_v10 }
 0x132   :  { %v1415_v9 = vpop.xlane.xlu1 %252  ;;  %v232_v13 = vpop.xlane.xlu2 %231 }
 0x133   :  { %v289_v12 = vperm.slane %v1415_v9, %v1380_v49  ;;  %v1422_v14 = vpop.xlane.xlu0 %255  ;;  %v282_v15 = vperm.slane %v232_v13, %v1380_v49 }
 0x134   :  { %v290_v16 = vperm.slane %v1422_v14, %v1380_v49 }
 0x135   :  { %v310_v19 = vsel %vm1853_vm7, %v289_v12, %v309_v17  ;;  %v304_v21 = vsel %vm1852_vm8, %v282_v15, %v302_v18 }
 0x136   :  { %v311_v22 = vsel %vm1852_vm8, %v290_v16, %v310_v19  ;;  %v315_v23 = vsel %vm314_vm9, %v304_v21, -inf }
 0x137   :  { %v318_v24 = vsel %vm314_vm9, %v311_v22, -inf  ;;  %316 = vmax.xlane.f32.xlu1 %v315_v23 }
 0x138   :  { %319 = vmax.xlane.f32.xlu2 %v318_v24 }
 0x1aa   :  { %v317_v27 = vpop.xlane.xlu1 %316 }
 0x1ab   :  { %v324_v20 = vperm.slane %v317_v27, 1  ;;  %v323_v28 = vperm.slane %v317_v27, 0  ;;  %v325_v29 = vperm.slane %v317_v27, 2  ;;  %v327_v33 = vperm.slane %v317_v27, 4  ;;  %v1436_v51 = vpop.xlane.xlu2 %319 }
 0x1ac   :  { %v330_v34 = vperm.slane %v317_v27, 7  ;;  %v326_v35 = vperm.slane %v317_v27, 3  ;;  %v328_v59 = vperm.slane %v317_v27, 5  ;;  %v332_v0 = vperm.slane %v1436_v51, 1 }
 0x1ad   :  { %v356_v30 = vsub.f32 %v214_v44, %v324_v20  ;;  %v355_v31 = vsub.f32 %v1364_v39, %v323_v28  ;;  %v357_v32 = vsub.f32 %v217_v47, %v325_v29  ;;  %v359_v45 = vsub.f32 %v1366_v40, %v327_v33 }
 0x1ae   :  { %v362_v50 = vsub.f32 %v232_v13, %v330_v34  ;;  %v358_v52 = vsub.f32 %v220_v58, %v326_v35  ;;  %v329_v44 = vperm.slane %v317_v27, 6  ;;  %v333_v39 = vperm.slane %v1436_v51, 2 }
 0x1af   :  { %v373_v36 = vmul.f32 1.442695, %v356_v30  ;;  %v371_v37 = vmul.f32 1.442695, %v355_v31  ;;  %v375_v38 = vmul.f32 1.442695, %v357_v32  ;;  %v360_v62 = vsub.f32 %v1372_v43, %v328_v59 }
 0x1b0   :  { %v379_v53 = vmul.f32 1.442695, %v359_v45  ;;  %v385_v55 = vmul.f32 1.442695, %v362_v50  ;;  %v377_v56 = vmul.f32 1.442695, %v358_v52  ;;  %v361_v58 = vsub.f32 %v1378_v48, %v329_v44 }
 0x1b1   :  { %1110 = vpow2.f32 %v373_v36  ;;  %v365_v61 = vsub.f32 %v1394_v57, %v333_v39  ;;  %v336_v2 = vperm.slane %v1436_v51, 5  ;;  %v381_v4 = vmul.f32 1.442695, %v360_v62 }
 0x1b2   :  { %1112 = vpow2.f32 %v371_v37  ;;  %v383_v63 = vmul.f32 1.442695, %v361_v58  ;;  %v331_v5 = vperm.slane %v1436_v51, 0  ;;  %v364_v43 = vsub.f32 %v1376_v46, %v332_v0 }
 0x1b3   :  { %1114 = vpow2.f32 %v375_v38  ;;  %v391_v1 = vmul.f32 1.442695, %v365_v61  ;;  %v368_v57 = vsub.f32 %v1374_v25, %v336_v2  ;;  %v335_v10 = vperm.slane %v1436_v51, 4 }
 0x1b4   :  { %1116 = vpow2.f32 %v379_v53  ;;  %v363_v7 = vsub.f32 %v1368_v41, %v331_v5  ;;  %v389_v8 = vmul.f32 1.442695, %v364_v43  ;;  %v334_v15 = vperm.slane %v1436_v51, 3 }
 0x1b5   :  { %1118 = vpow2.f32 %v385_v55  ;;  %v397_v11 = vmul.f32 1.442695, %v368_v57  ;;  %v367_v41 = vsub.f32 %v1370_v42, %v335_v10  ;;  %v338_v18 = vperm.slane %v1436_v51, 7 }
 0x1b6   :  { %1120 = vpow2.f32 %v377_v56  ;;  %v387_v13 = vmul.f32 1.442695, %v363_v7  ;;  %v366_v25 = vsub.f32 %v1388_v54, %v334_v15  ;;  %v337_v22 = vperm.slane %v1436_v51, 6 }
 0x1b7   :  { %v1439_v47 = vpop.eup %1110  ;;  %1122 = vpow2.f32 %v383_v63  ;;  %v395_v17 = vmul.f32 1.442695, %v367_v41  ;;  %v370_v42 = vsub.f32 %v1422_v14, %v338_v18 }
 0x1b8   :  { %v1441_v60 = vpop.eup %1112  ;;  %423 = vperm.xlu1 %1074, %v1439_v47   ;;  %1124 = vpow2.f32 %v391_v1  ;;  %v393_v21 = vmul.f32 1.442695, %v366_v25  ;;  %v369_v54 = vsub.f32 %v1415_v9, %v337_v22 }
 0x1b9   :  { %v1444_v40 = vpop.eup %1114  ;;  %420 = vperm.xlu0 %1073, %v1441_v60   ;;  %1126 = vpow2.f32 %v381_v4  ;;  %v401_v26 = vmul.f32 1.442695, %v370_v42 }
 0x1ba   :  { %426 = vperm.xlu2 %1075, %v1444_v40   ;;  %v1453_v3 = vpop.eup %1116  ;;  %1128 = vpow2.f32 %v389_v8  ;;  %v399_v20 = vmul.f32 1.442695, %v369_v54 }
 0x1bb   :  { %v1456_v48 = vpop.eup %1118  ;;  %1130 = vpow2.f32 %v397_v11 }
 0x1bc   :  { %v1459_v6 = vpop.eup %1120  ;;  %1132 = vpow2.f32 %v387_v13 }
 0x1bd   :  { %v1467_v12 = vpop.eup %1122  ;;  %1134 = vpow2.f32 %v395_v17 }
 0x1be   :  { %v1470_v16 = vpop.eup %1124  ;;  %1136 = vpow2.f32 %v393_v21 }
 0x1bf   :  { %v1473_v46 = vpop.eup %1126  ;;  %1138 = vpow2.f32 %v401_v26 }
 0x1c0   :  { %432 = vperm.xlu1 %1074, %v1453_v3   ;;  %v1480_v19 = vpop.eup %1128  ;;  %1140 = vpow2.f32 %v399_v20 }
 0x1c1   :  { %441 = vperm.xlu0 %1073, %v1456_v48   ;;  %v1483_v23 = vpop.eup %1130 }
 0x1c2   :  { %429 = vperm.xlu2 %1075, %v1459_v6   ;;  %v1486_v24 = vpop.eup %1132 }
 0x1c3   :  { %v1492_v27 = vpop.eup %1134 }
 0x1c4   :  { %v1495_v28 = vpop.eup %1136 }
 0x1c5   :  { %v1498_v29 = vpop.eup %1138 }
 0x1c6   :  { %v1501_v14 = vpop.eup %1140 }
 0x1c8   :  { %438 = vperm.xlu1 %1074, %v1467_v12  }
 0x1c9   :  { %450 = vperm.xlu0 %1073, %v1470_v16  }
 0x1ca   :  { %435 = vperm.xlu2 %1075, %v1473_v46  }
 0x1d0   :  { %447 = vperm.xlu1 %1074, %v1480_v19  }
 0x1d1   :  { %459 = vperm.xlu0 %1073, %v1483_v23  }
 0x1d2   :  { %444 = vperm.xlu2 %1075, %v1486_v24  }
 0x1d8   :  { %456 = vperm.xlu1 %1074, %v1492_v27  }
 0x1da   :  { %453 = vperm.xlu2 %1075, %v1495_v28  }
 0x1e0   :  { %465 = vperm.xlu1 %1074, %v1498_v29  }
 0x1e2   :  { %462 = vperm.xlu2 %1075, %v1501_v14  }
 0x214   :  { %v427_v9 = vpop.permute.xlu2 %426 }
 0x215   :  { %v469_v38 = vperm.slane %v427_v9, %v1380_v49 }
 0x21c   :  { %v430_v30 = vpop.permute.xlu2 %429 }
 0x21d   :  { %v470_v51 = vperm.slane %v430_v30, %v1380_v49 }
 0x224   :  { %v436_v35 = vpop.permute.xlu2 %435 }
 0x225   :  { %v472_v55 = vperm.slane %v436_v35, %v1380_v49 }
 0x22a   :  { %v424_v31 = vpop.permute.xlu1 %423 }
 0x22b   :  { %v421_v32 = vpop.permute.xlu0 %420  ;;  %v468_v33 = vperm.slane %v424_v31, %v1380_v49 }
 0x22c   :  { %v467_v34 = vperm.slane %v421_v32, %v1380_v49  ;;  %v445_v56 = vpop.permute.xlu2 %444 }
 0x22d   :  { %v475_v5 = vperm.slane %v445_v56, %v1380_v49 }
 0x22e   :  { %v483_v36 = vsel %vm291_vm2, %v468_v33, %v467_v34 }
 0x22f   :  { %v484_v45 = vsel %vm293_vm3, %v469_v38, %v483_v36 }
 0x230   :  { %v485_v52 = vsel %vm295_vm4, %v470_v51, %v484_v45 }
 0x232   :  { %v433_v37 = vpop.permute.xlu1 %432 }
 0x233   :  { %v471_v50 = vperm.slane %v433_v37, %v1380_v49  ;;  %v442_v53 = vpop.permute.xlu0 %441 }
 0x234   :  { %v474_v58 = vperm.slane %v442_v53, %v1380_v49  ;;  %v454_v43 = vpop.permute.xlu2 %453 }
 0x235   :  { %v486_v44 = vsel %vm297_vm5, %v471_v50, %v485_v52  ;;  %v478_v11 = vperm.slane %v454_v43, %v1380_v49 }
 0x236   :  { %v487_v61 = vsel %vm1854_vm6, %v472_v55, %v486_v44 }
 0x23a   :  { %v439_v39 = vpop.permute.xlu1 %438 }
 0x23b   :  { %v473_v59 = vperm.slane %v439_v39, %v1380_v49  ;;  %v451_v1 = vpop.permute.xlu0 %450 }
 0x23c   :  { %v477_v7 = vperm.slane %v451_v1, %v1380_v49  ;;  %v463_v17 = vpop.permute.xlu2 %462 }
 0x23d   :  { %v488_v62 = vsel %vm1853_vm7, %v473_v59, %v487_v61  ;;  %v481_v22 = vperm.slane %v463_v17, %v1380_v49 }
 0x23e   :  { %v489_v63 = vsel %vm1852_vm8, %v474_v58, %v488_v62 }
 0x23f   :  { %v499_v0 = vsel %vm314_vm9, %v489_v63, 0.0 }
 0x240   :  { %500 = vadd.xlane.f32.xlu0 %v499_v0 }
 0x242   :  { %v448_v2 = vpop.permute.xlu1 %447 }
 0x243   :  { %v476_v4 = vperm.slane %v448_v2, %v1380_v49  ;;  %v460_v15 = vpop.permute.xlu0 %459 }
 0x244   :  { %v480_v18 = vperm.slane %v460_v15, %v1380_v49 }
 0x245   :  { %v490_v57 = vsel %vm291_vm2, %v476_v4, %v475_v5 }
 0x246   :  { %v491_v8 = vsel %vm293_vm3, %v477_v7, %v490_v57 }
 0x247   :  { %v492_v41 = vsel %vm295_vm4, %v478_v11, %v491_v8 }
 0x24a   :  { %v457_v10 = vpop.permute.xlu1 %456 }
 0x24b   :  { %v479_v13 = vperm.slane %v457_v10, %v1380_v49 }
 0x24d   :  { %v493_v25 = vsel %vm297_vm5, %v479_v13, %v492_v41 }
 0x24e   :  { %v494_v21 = vsel %vm1854_vm6, %v480_v18, %v493_v25 }
 0x24f   :  { %v495_v26 = vsel %vm1853_vm7, %v481_v22, %v494_v21 }
 0x252   :  { %v466_v42 = vpop.permute.xlu1 %465 }
 0x253   :  { %v482_v54 = vperm.slane %v466_v42, %v1380_v49 }
 0x255   :  { %v496_v20 = vsel %vm1852_vm8, %v482_v54, %v495_v26 }
 0x256   :  { %v502_v9 = vsel %vm314_vm9, %v496_v20, 0.0 }
 0x257   :  { %503 = vadd.xlane.f32.xlu2 %v502_v9 }
 0x2b3   :  { %v1536_v30 = vpop.xlane.xlu0 %500 }
 0x2b4   :  { %v507_v31 = vperm.slane %v1536_v30, 0  ;;  %v1540_v32 = vperm.slane %v1536_v30, 1  ;;  %v1543_v33 = vperm.slane %v1536_v30, 2  ;;  %v1546_v34 = vperm.slane %v1536_v30, 3 }
 0x2b5   :  { %v513_v49 = vperm.slane %v1536_v30, 6  ;;  %v1552_v35 = vperm.slane %v1536_v30, 4  ;;  %v1567_v39 = vperm.slane %v1536_v30, 5 }
 0x2b6   :  { %1142 = vrcp.f32 %v507_v31  ;;  %v548_v50 = vand.u32 2147483647, %v507_v31  ;;  %v550_v44 = vand.u32 2147483648, %v507_v31  ;;  %vm544_vm11 = vweird.f32 %v507_v31 }
 0x2b7   :  { %1144 = vrcp.f32 %v1540_v32  ;;  %v638_v56 = vand.u32 2147483647, %v513_v49  ;;  %vm634_vm10 = vweird.f32 %v513_v49  ;;  %v640_v63 = vand.u32 2147483648, %v513_v49 }
 0x2b8   :  { %1146 = vrcp.f32 %v1543_v33  ;;  %vm1571_vm13 = vcmp.eq.f32.partialorder %v548_v50, 8.507059e+37  ;;  %v551_v57 = vor.u32 1.1754944e-38, %v550_v44  ;;  %vm559_vm1 = vweird.f32 %v1540_v32 }
 0x2b9   :  { %1148 = vrcp.f32 %v1546_v34  ;;  %vm1578_vm14 = vcmp.eq.f32.partialorder %v638_v56, 8.507059e+37  ;;  %v563_v10 = vand.u32 2147483647, %v1540_v32  ;;  %v565_v11 = vand.u32 2147483648, %v1540_v32 }
 0x2ba   :  { %1150 = vrcp.f32 %v513_v49  ;;  %v641_v25 = vor.u32 1.1754944e-38, %v640_v63  ;;  %v578_v9 = vand.u32 2147483647, %v1543_v33  ;;  %v593_v63 = vand.u32 2147483647, %v1546_v34 }
 0x2bb   :  { %1152 = vrcp.f32 %v1552_v35 }
 0x2bc   :  { %v1143_v36 = vpop.eup %1142  ;;  %1154 = vrcp.f32 %v1567_v39 }
 0x2bd   :  { %v1555_v37 = vpop.eup %1144  ;;  %v540_v38 = vmul.f32 %v1143_v36, %v507_v31  ;;  %vm545_vm12 = vweird.f32 %v1143_v36 }
 0x2be   :  { %v1558_v45 = vpop.eup %1146  ;;  %v555_v51 = vmul.f32 %v1555_v37, %v1540_v32  ;;  %vm546_vm15 = vmor %vm544_vm11, %vm545_vm12  ;;  %vm560_vm9 = vweird.f32 %v1555_v37  ;;  %v580_v32 = vand.u32 2147483648, %v1543_v33 }
 0x2bf   :  { %v1562_v52 = vpop.eup %1148  ;;  %v541_v53 = vsub.f32 1.0, %v540_v38  ;;  %v570_v55 = vmul.f32 %v1558_v45, %v1543_v33  ;;  %vm1597_vm12 = vmor %vm559_vm1, %vm560_vm9  ;;  %vm575_vm9 = vweird.f32 %v1558_v45 }
 0x2c0   :  { %v556_v59 = vsub.f32 1.0, %v555_v51  ;;  %v585_v58 = vmul.f32 %v1562_v52, %v1546_v34  ;;  %v1151_v62 = vpop.eup %1150  ;;  %vm590_vm8 = vweird.f32 %v1562_v52 }
 0x2c1   :  { %v542_v61 = vmul.f32 %v1143_v36, %v541_v53  ;;  %v571_v2 = vsub.f32 1.0, %v570_v55  ;;  %v1576_v4 = vpop.eup %1152  ;;  %v630_v5 = vmul.f32 %v1151_v62, %v513_v49  ;;  %vm635_vm11 = vweird.f32 %v1151_v62 }
 0x2c2   :  { %v557_v1 = vmul.f32 %v1555_v37, %v556_v59  ;;  %v586_v7 = vsub.f32 1.0, %v585_v58  ;;  %v600_v21 = vmul.f32 %v1576_v4, %v1552_v35  ;;  %vm636_vm1 = vmor %vm634_vm10, %vm635_vm11  ;;  %vm589_vm10 = vweird.f32 %v1546_v34  ;;  %v1642_v0 = vpop.eup %1154 }
 0x2c3   :  { %v543_v43 = vadd.f32 %v1143_v36, %v542_v61  ;;  %v631_v13 = vsub.f32 1.0, %v630_v5  ;;  %v572_v18 = vmul.f32 %v1558_v45, %v571_v2  ;;  %v595_v59 = vand.u32 2147483648, %v1546_v34 }
 0x2c4   :  { %v558_v41 = vadd.f32 %v1555_v37, %v557_v1  ;;  %v587_v54 = vmul.f32 %v1562_v52, %v586_v7  ;;  %v601_v51 = vsub.f32 1.0, %v600_v21  ;;  %v581_v1 = vor.u32 1.1754944e-38, %v580_v32 }
 0x2c5   :  { %v547_v15 = vsel %vm546_vm15, %v1143_v36, %v543_v43  ;;  %v632_v22 = vmul.f32 %v1151_v62, %v631_v13  ;;  %vm574_vm15 = vweird.f32 %v1543_v33  ;;  %v566_v36 = vor.u32 1.1754944e-38, %v565_v11 }
 0x2c6   :  { %v552_v17 = vsel %vm1571_vm13, %v551_v57, %v547_v15  ;;  %vm1601_vm13 = vcmp.eq.f32.partialorder %v563_v10, 8.507059e+37  ;;  %v573_v50 = vadd.f32 %v1558_v45, %v572_v18  ;;  %v588_v55 = vadd.f32 %v1562_v52, %v587_v54  ;;  %vm1637_vm11 = vmor %vm574_vm15, %vm575_vm9 }
 0x2c7   :  { %v553_v42 = vmul.f32 %v1441_v60, %v552_v17  ;;  %v633_v31 = vadd.f32 %v1151_v62, %v632_v22  ;;  %v562_v60 = vsel %vm1597_vm12, %v1555_v37, %v558_v41  ;;  %v610_v33 = vand.u32 2147483648, %v1552_v35 }
 0x2c8   :  { %v567_v56 = vsel %vm1601_vm13, %v566_v36, %v562_v60  ;;  %v602_v43 = vmul.f32 %v1576_v4, %v601_v51  ;;  %vm579_vm12 = vcmp.eq.f32.partialorder %v578_v9, 8.507059e+37  ;;  %v608_v10 = vand.u32 2147483647, %v1552_v35 }
 0x2c9   :  { %781 = vperm.xlu1 %1074, %v553_v42   ;;  %v637_v53 = vsel %vm636_vm1, %v1151_v62, %v633_v31  ;;  %v568_v34 = vmul.f32 %v1439_v47, %v567_v56  ;;  %v1662_v11 = vor.u32 1.1754944e-38, %v610_v33  ;;  %vm605_vm13 = vweird.f32 %v1576_v4 }
 0x2ca   :  { %v1612_v38 = vpop.xlane.xlu2 %503  ;;  %v642_v49 = vsel %vm1578_vm14, %v641_v25, %v637_v53  ;;  %vm591_vm14 = vmor %vm589_vm10, %vm590_vm8  ;;  %vm594_vm8 = vcmp.eq.f32.partialorder %v593_v63, 8.507059e+37  ;;  %v1670_v15 = vadd.f32 %v1576_v4, %v602_v43  ;;  %v615_v54 = vmul.f32 %v1642_v0, %v1567_v39 }
 0x2cb   :  { %v1618_v44 = vperm.slane %v1612_v38, 0  ;;  %v1621_v37 = vperm.slane %v1612_v38, 1  ;;  %v643_v58 = vmul.f32 %v1467_v12, %v642_v49  ;;  %v1632_v61 = vperm.slane %v1612_v38, 4 }
 0x2cc   :  { %v577_v12 = vsel %vm1637_vm11, %v1558_v45, %v573_v50  ;;  %v1652_v2 = vperm.slane %v1612_v38, 6  ;;  %v592_v5 = vsel %vm591_vm14, %v1562_v52, %v588_v55  ;;  %v1658_v57 = vperm.slane %v1612_v38, 7 }
 0x2cd   :  { %1156 = vrcp.f32 %v1618_v44  ;;  %811 = vperm.xlu2 %1075, %v643_v58   ;;  %v596_v45 = vor.u32 1.1754944e-38, %v595_v59  ;;  %v582_v7 = vsel %vm579_vm12, %v581_v1, %v577_v12  ;;  %v1665_v52 = vperm.slane %v1612_v38, 2 }
 0x2ce   :  { %1158 = vrcp.f32 %v1621_v37  ;;  %v683_v13 = vand.u32 2147483647, %v1621_v37  ;;  %v583_v25 = vmul.f32 %v1444_v40, %v582_v7  ;;  %v685_v17 = vand.u32 2147483648, %v1621_v37 }
 0x2cf   :  { %1160 = vrcp.f32 %v1632_v61  ;;  %v597_v8 = vsel %vm594_vm8, %v596_v45, %v592_v5  ;;  %v668_v22 = vand.u32 2147483647, %v1618_v44  ;;  %v1683_v26 = vperm.slane %v1612_v38, 3 }
 0x2d0   :  { %1162 = vrcp.f32 %v1652_v2  ;;  %v598_v42 = vmul.f32 %v1459_v6, %v597_v8  ;;  %vm679_vm15 = vweird.f32 %v1621_v37  ;;  %v670_v20 = vand.u32 2147483648, %v1618_v44 }
 0x2d1   :  { %786 = vperm.xlu1 %1074, %v568_v34   ;;  %1164 = vrcp.f32 %v1658_v57  ;;  %vm604_vm1 = vweird.f32 %v1552_v35  ;;  %vm1691_vm9 = vcmp.eq.f32.partialorder %v683_v13, 8.507059e+37  ;;  %vm664_vm10 = vweird.f32 %v1618_v44 }
 0x2d2   :  { %1166 = vrcp.f32 %v1665_v52  ;;  %v686_v60 = vor.u32 1.1754944e-38, %v685_v17  ;;  %vm1700_vm12 = vcmp.eq.f32.partialorder %v668_v22, 8.507059e+37  ;;  %vm724_vm8 = vweird.f32 %v1632_v61 }
 0x2d3   :  { %v1157_v47 = vpop.eup %1156  ;;  %v671_v56 = vor.u32 1.1754944e-38, %v670_v20  ;;  %v728_v63 = vand.u32 2147483647, %v1632_v61  ;;  %v730_v12 = vand.u32 2147483648, %v1632_v61  ;;  %v616_v43 = vsub.f32 1.0, %v615_v54 }
 0x2d4   :  { %v1159_v41 = vpop.eup %1158  ;;  %v660_v18 = vmul.f32 %v1157_v47, %v1618_v44  ;;  %vm665_vm11 = vweird.f32 %v1157_v47  ;;  %1168 = vrcp.f32 %v1683_v26 }
 0x2d5   :  { %v675_v21 = vmul.f32 %v1159_v41, %v1621_v37  ;;  %v1688_v9 = vpop.eup %1160  ;;  %vm680_vm14 = vweird.f32 %v1159_v41  ;;  %vm666_vm7 = vmor %vm664_vm10, %vm665_vm11  ;;  %v617_v54 = vmul.f32 %v1642_v0, %v616_v43  ;;  %vm620_vm11 = vweird.f32 %v1642_v0 }
 0x2d6   :  { %v661_v40 = vsub.f32 1.0, %v660_v18  ;;  %v720_v32 = vmul.f32 %v1688_v9, %v1632_v61  ;;  %v1698_v50 = vpop.eup %1162  ;;  %vm681_vm6 = vmor %vm679_vm15, %vm680_vm14  ;;  %vm725_vm10 = vweird.f32 %v1688_v9  ;;  %vm729_vm14 = vcmp.eq.f32.partialorder %v728_v63, 8.507059e+37 }
 0x2d7   :  { %v676_v31 = vsub.f32 1.0, %v675_v21  ;;  %v1165_v55 = vpop.eup %1164  ;;  %v750_v58 = vmul.f32 %v1698_v50, %v1652_v2  ;;  %vm1738_vm15 = vmor %vm724_vm8, %vm725_vm10  ;;  %vm755_vm8 = vweird.f32 %v1698_v50  ;;  %vm619_vm10 = vweird.f32 %v1567_v39 }
 0x2d8   :  { %v662_v36 = vmul.f32 %v1157_v47, %v661_v40  ;;  %v721_v59 = vsub.f32 1.0, %v720_v32  ;;  %v765_v1 = vmul.f32 %v1165_v55, %v1658_v57  ;;  %v1715_v45 = vpop.eup %1166 }
 0x2d9   :  { %791 = vperm.xlu1 %1074, %v583_v25   ;;  %v677_v51 = vmul.f32 %v1159_v41, %v676_v31  ;;  %v751_v5 = vsub.f32 1.0, %v750_v58  ;;  %v775_v25 = vand.u32 2147483648, %v1658_v57  ;;  %v690_v20 = vmul.f32 %v1715_v45, %v1665_v52 }
 0x2da   :  { %v663_v49 = vadd.f32 %v1157_v47, %v662_v36  ;;  %v722_v34 = vmul.f32 %v1688_v9, %v721_v59  ;;  %v766_v8 = vsub.f32 1.0, %v765_v1  ;;  %v731_v31 = vor.u32 1.1754944e-38, %v730_v12 }
 0x2db   :  { %v678_v62 = vadd.f32 %v1159_v41, %v677_v51  ;;  %v752_v22 = vmul.f32 %v1698_v50, %v751_v5  ;;  %v691_v35 = vsub.f32 1.0, %v690_v20  ;;  %v514_v58 = vperm.slane %v1536_v30, 7 }
 0x2dc   :  { %v667_v33 = vsel %vm666_vm7, %v1157_v47, %v663_v49  ;;  %v723_v47 = vadd.f32 %v1688_v9, %v722_v34  ;;  %v767_v18 = vmul.f32 %v1165_v55, %v766_v8  ;;  %vm770_vm7 = vweird.f32 %v1165_v55  ;;  %v1175_v49 = vld [vmem:[#allocation2 + $0x40] sm:$0xff] }
 0x2dd   :  { %v682_v7 = vsel %vm681_vm6, %v1159_v41, %v678_v62  ;;  %v672_v44 = vsel %vm1700_vm12, %v671_v56, %v667_v33  ;;  %v773_v41 = vand.u32 2147483647, %v1658_v57  ;;  %vm1731_vm6 = vmor %vm604_vm1, %vm605_vm13  ;;  %vm769_vm13 = vweird.f32 %v1658_v57 }
 0x2de   :  { %v687_v13 = vsel %vm1691_vm9, %v686_v60, %v682_v7  ;;  %v673_v37 = vmul.f32 %v1486_v24, %v672_v44  ;;  %v727_v40 = vsel %vm1738_vm15, %v1688_v9, %v723_v47  ;;  %v768_v61 = vadd.f32 %v1165_v55, %v767_v18  ;;  %vm771_vm1 = vmor %vm769_vm13, %vm770_vm7 }
 0x2df   :  { %v688_v17 = vmul.f32 %v1480_v19, %v687_v13  ;;  %v607_v19 = vsel %vm1731_vm6, %v1576_v4, %v1670_v15  ;;  %v776_v4 = vor.u32 1.1754944e-38, %v775_v25  ;;  %vm609_vm9 = vcmp.eq.f32.partialorder %v608_v10, 8.507059e+37  ;;  %v1169_v10 = vpop.eup %1168  ;;  %vm1775_vm6 = vmor %vm619_vm10, %vm620_vm11 }
 0x2e0   :  { %821 = vperm.xlu2 %1075, %v673_v37   ;;  %v772_v15 = vsel %vm771_vm1, %v1165_v55, %v768_v61  ;;  %vm774_vm12 = vcmp.eq.f32.partialorder %v773_v41, 8.507059e+37  ;;  %v1760_v9 = vperm.slane %v1612_v38, 5  ;;  %v732_v57 = vsel %vm729_vm14, %v731_v31, %v727_v40 }
 0x2e1   :  { %826 = vperm.xlu0 %1073, %v688_v17   ;;  %796 = vperm.xlu1 %1074, %v598_v42   ;;  %v612_v42 = vsel %vm609_vm9, %v1662_v11, %v607_v19  ;;  %v777_v6 = vsel %vm774_vm12, %v776_v4, %v772_v15  ;;  %v618_v60 = vadd.f32 %v1642_v0, %v617_v54  ;;  %v760_v11 = vand.u32 2147483648, %v1652_v2 }
 0x2e2   :  { %v753_v36 = vadd.f32 %v1698_v50, %v752_v22  ;;  %v778_v32 = vmul.f32 %v1498_v29, %v777_v6  ;;  %v613_v51 = vmul.f32 %v1453_v3, %v612_v42  ;;  %v625_v38 = vand.u32 2147483648, %v1567_v39 }
 0x2e3   :  { %v733_v53 = vmul.f32 %v1492_v27, %v732_v57  ;;  %vm754_vm7 = vweird.f32 %v1652_v2  ;;  %v758_v55 = vand.u32 2147483647, %v1652_v2  ;;  %v623_v29 = vand.u32 2147483647, %v1567_v39 }
 0x2e4   :  { %1170 = vrcp.f32 %v1760_v9  ;;  %vm756_vm15 = vmor %vm754_vm7, %vm755_vm8  ;;  %v622_v3 = vsel %vm1775_vm6, %v1642_v0, %v618_v60  ;;  %v692_v2 = vmul.f32 %v1715_v45, %v691_v35  ;;  %v705_v56 = vmul.f32 %v1169_v10, %v1683_v26 }
 0x2e5   :  { %v757_v27 = vsel %vm756_vm15, %v1698_v50, %v753_v36  ;;  %v761_v59 = vor.u32 1.1754944e-38, %v760_v11  ;;  %v626_v39 = vor.u32 1.1754944e-38, %v625_v38  ;;  %vm759_vm13 = vcmp.eq.f32.partialorder %v758_v55, 8.507059e+37 }
 0x2e6   :  { %vm624_vm1 = vcmp.eq.f32.partialorder %v623_v29, 8.507059e+37  ;;  %v693_v12 = vadd.f32 %v1715_v45, %v692_v2  ;;  %vm695_vm9 = vweird.f32 %v1715_v45  ;;  %v706_v0 = vsub.f32 1.0, %v705_v56  ;;  %v1177_v56 = vld [vmem:[#allocation2 + $0x8] sm:$0xff] }
 0x2e7   :  { %v762_v62 = vsel %vm759_vm13, %v761_v59, %v757_v27  ;;  %v627_v63 = vsel %vm624_vm1, %v626_v39, %v622_v3  ;;  %v700_v50 = vand.u32 2147483648, %v1665_v52  ;;  %vm694_vm11 = vweird.f32 %v1665_v52  ;;  %v1176_v3 = vld [vmem:[#allocation2] sm:$0xff] }
 0x2e8   :  { %856 = vperm.xlu2 %1075, %v778_v32   ;;  %v763_v33 = vmul.f32 %v1501_v14, %v762_v62  ;;  %v628_v34 = vmul.f32 %v1473_v46, %v627_v63  ;;  %v698_v5 = vand.u32 2147483647, %v1665_v52  ;;  %1172 = vrcp.f32 %v514_v58  ;;  %vm696_vm14 = vmor %vm694_vm11, %vm695_vm9  ;;  %v1178_v63 = vld [vmem:[#allocation2 + $0x78] sm:$0xff] }
 0x2e9   :  { %841 = vperm.xlu0 %1073, %v733_v53   ;;  %801 = vperm.xlu1 %1074, %v613_v51   ;;  %v697_v30 = vsel %vm696_vm14, %v1715_v45, %v693_v12  ;;  %v707_v43 = vmul.f32 %v1169_v10, %v706_v0  ;;  %v701_v44 = vor.u32 1.1754944e-38, %v700_v50  ;;  %vm710_vm8 = vweird.f32 %v1169_v10  ;;  %v1174_v53 = vld [vmem:[#allocation2 + $0x48] sm:$0xff] }
 0x2ea   :  { %v1171_v1 = vpop.eup %1170  ;;  %vm699_vm12 = vcmp.eq.f32.partialorder %v698_v5, 8.507059e+37  ;;  %v715_v37 = vand.u32 2147483648, %v1683_v26  ;;  %vm709_vm10 = vweird.f32 %v1683_v26  ;;  %v713_v47 = vand.u32 2147483647, %v1683_v26  ;;  %v1181_v5 = vld [vmem:[#allocation2 + $0x10] sm:$0xff] }
 0x2eb   :  { %v735_v7 = vmul.f32 %v1171_v1, %v1760_v9  ;;  %v702_v8 = vsel %vm699_vm12, %v701_v44, %v697_v30  ;;  %v708_v13 = vadd.f32 %v1169_v10, %v707_v43  ;;  %vm711_vm7 = vmor %vm709_vm10, %vm710_vm8  ;;  %vm740_vm15 = vweird.f32 %v1171_v1 }
 0x2ec   :  { %v703_v52 = vmul.f32 %v1470_v16, %v702_v8  ;;  %v716_v18 = vor.u32 1.1754944e-38, %v715_v37  ;;  %vm714_vm6 = vcmp.eq.f32.partialorder %v713_v47, 8.507059e+37  ;;  %v745_v19 = vand.u32 2147483648, %v1760_v9  ;;  %v1184_v47 = vld [vmem:[#allocation2 + $0x20] sm:$0xff] }
 0x2ed   :  { %v736_v14 = vsub.f32 1.0, %v735_v7  ;;  %v712_v45 = vsel %vm711_vm7, %v1169_v10, %v708_v13  ;;  %vm739_vm13 = vweird.f32 %v1760_v9  ;;  %v743_v16 = vand.u32 2147483647, %v1760_v9  ;;  %v1182_v7 = vld [vmem:[#allocation2 + $0x60] sm:$0xff] }
 0x2ee   :  { %v1173_v46 = vpop.eup %1172  ;;  %v717_v41 = vsel %vm714_vm6, %v716_v18, %v712_v45  ;;  %vm741_vm1 = vmor %vm739_vm13, %vm740_vm15  ;;  %v746_v40 = vor.u32 1.1754944e-38, %v745_v19  ;;  %v655_v31 = vand.u32 2147483648, %v514_v58  ;;  %vm649_vm14 = vweird.f32 %v514_v58 }
 0x2ef   :  { %v737_v25 = vmul.f32 %v1171_v1, %v736_v14  ;;  %v645_v17 = vmul.f32 %v1173_v46, %v514_v58  ;;  %v718_v22 = vmul.f32 %v1495_v28, %v717_v41  ;;  %vm744_vm9 = vcmp.eq.f32.partialorder %v743_v16, 8.507059e+37  ;;  %v1183_v14 = vld [vmem:[#allocation2 + $0x18] sm:$0xff] }
 0x2f0   :  { %vm650_vm11 = vweird.f32 %v1173_v46  ;;  %v653_v15 = vand.u32 2147483647, %v514_v58  ;;  %v656_v42 = vor.u32 1.1754944e-38, %v655_v31  ;;  %vm1875_vm10 = vcmask 1045509  }
 0x2f1   :  { %851 = vperm.xlu0 %1073, %v763_v33   ;;  %806 = vperm.xlu1 %1074, %v628_v34   ;;  %v738_v21 = vadd.f32 %v1171_v1, %v737_v25  ;;  %v646_v24 = vsub.f32 1.0, %v645_v17  ;;  %vm651_vm12 = vmor %vm649_vm14, %vm650_vm11  ;;  %v1180_v33 = vld [vmem:[#allocation2 + $0x30] sm:$0xff]  ;;  %vm1876_vm7 = vcmask 1046534   ;;  %vm1877_vm6 = vcmask 1047559  }
 0x2f2   :  { %vm654_vm8 = vcmp.eq.f32.partialorder %v653_v15, 8.507059e+37  ;;  %v1185_v25 = vld [vmem:[#allocation2 + $0x70] sm:$0xff]  ;;  %vm1878_vm15 = vmmov %vm1875_vm10 }
 0x2f3   :  { %v742_v26 = vsel %vm741_vm1, %v1171_v1, %v738_v21  ;;  %v647_v54 = vmul.f32 %v1173_v46, %v646_v24  ;;  %v1179_v1 = vld [vmem:[#allocation2 + $0x50] sm:$0xff]  ;;  %v1186_v21 = vld [vmem:[#allocation2 + $0x28] sm:$0xff] }
 0x2f4   :  { %v747_v61 = vsel %vm744_vm9, %v746_v40, %v742_v26 }
 0x2f5   :  { %v648_v20 = vadd.f32 %v1173_v46, %v647_v54  ;;  %v748_v4 = vmul.f32 %v1483_v23, %v747_v61 }
 0x2f7   :  { %v652_v28 = vsel %vm651_vm12, %v1173_v46, %v648_v20 }
 0x2f8   :  { %v657_v9 = vsel %vm654_vm8, %v656_v42, %v652_v28 }
 0x2f9   :  { %831 = vperm.xlu1 %1074, %v703_v52   ;;  %v658_v57 = vmul.f32 %v1456_v48, %v657_v9 }
 0x301   :  { %836 = vperm.xlu1 %1074, %v718_v22  }
 0x309   :  { %846 = vperm.xlu1 %1074, %v748_v4  }
 0x311   :  { %816 = vperm.xlu1 %1074, %v658_v57  }
 0x327   :  { %v812_v10 = vpop.permute.xlu2 %811 }
 0x328   :  { %v865_v34 = vmul.f32 %v1180_v33, %v812_v10 }
 0x32a   :  { %v917_v54 = vsel %vm58_vm0, %v865_v34, 0.0 }
 0x33a   :  { %v822_v11 = vpop.permute.xlu2 %821 }
 0x33b   :  { %v782_v6 = vpop.permute.xlu1 %781  ;;  %v867_v29 = vmul.f32 %v1175_v49, %v822_v11 }
 0x33c   :  { %v859_v27 = vmul.f32 %v1176_v3, %v782_v6 }
 0x33d   :  { %v931_v39 = vsel %vm58_vm0, %v867_v29, 0.0 }
 0x33e   :  { %v875_v62 = vsel %vm58_vm0, %v859_v27, 0.0  ;;  %v932_v8 = vrot.slane %v931_v39, 4 }
 0x33f   :  { %v876_v52 = vrot.slane %v875_v62, 4 }
 0x340   :  { %v933_v40 = vadd.f32 %v932_v8, %v931_v39 }
 0x341   :  { %v877_v31 = vadd.f32 %v876_v52, %v875_v62 }
 0x342   :  { %v857_v2 = vpop.permute.xlu2 %856 }
 0x343   :  { %v787_v60 = vpop.permute.xlu1 %786  ;;  %v874_v12 = vmul.f32 %v1178_v63, %v857_v2  ;;  %v878_v49 = vrot.slane %v877_v31, 2 }
 0x344   :  { %v860_v48 = vmul.f32 %v1177_v56, %v787_v60  ;;  %v1187_v60 = vld [vmem:[#allocation2 + $0x58] sm:$0xff] }
 0x345   :  { %v980_v41 = vsel %vm58_vm0, %v874_v12, 0.0 }
 0x346   :  { %v882_v13 = vsel %vm58_vm0, %v860_v48, 0.0  ;;  %v981_v4 = vrot.slane %v980_v41, 4 }
 0x347   :  { %v883_v19 = vrot.slane %v882_v13, 4 }
 0x348   :  { %v982_v27 = vadd.f32 %v981_v4, %v980_v41 }
 0x349   :  { %v884_v10 = vadd.f32 %v883_v19, %v882_v13 }
 0x34b   :  { %v792_v36 = vpop.permute.xlu1 %791  ;;  %v885_v48 = vrot.slane %v884_v10, 2 }
 0x34c   :  { %v861_v30 = vmul.f32 %v1181_v5, %v792_v36 }
 0x34d   :  { %v886_v13 = vadd.f32 %v885_v48, %v884_v10  ;;  %v1189_v10 = vld [vmem:[#allocation2 + $0x38] sm:$0xff] }
 0x34e   :  { %v889_v22 = vsel %vm58_vm0, %v861_v30, 0.0  ;;  %v983_v30 = vrot.slane %v982_v27, 2 }
 0x34f   :  { %v890_v9 = vrot.slane %v889_v22, 4 }
 0x350   :  { %v984_v19 = vadd.f32 %v983_v30, %v982_v27 }
 0x351   :  { %v891_v2 = vadd.f32 %v890_v9, %v889_v22 }
 0x353   :  { %v797_v35 = vpop.permute.xlu1 %796  ;;  %v827_v32 = vpop.permute.xlu0 %826 }
 0x354   :  { %v868_v55 = vmul.f32 %v1174_v53, %v827_v32  ;;  %v862_v46 = vmul.f32 %v1183_v14, %v797_v35  ;;  %v918_v35 = vrot.slane %v917_v54, 4 }
 0x356   :  { %v938_v59 = vsel %vm58_vm0, %v868_v55, 0.0  ;;  %v896_v61 = vsel %vm58_vm0, %v862_v46, 0.0  ;;  %v934_v55 = vrot.slane %v933_v40, 2  ;;  %v919_v62 = vadd.f32 %v918_v35, %v917_v54 }
 0x357   :  { %v939_v43 = vrot.slane %v938_v59, 4 }
 0x359   :  { %v940_v16 = vadd.f32 %v939_v43, %v938_v59  ;;  %v892_v43 = vrot.slane %v891_v2, 2 }
 0x35b   :  { %v802_v51 = vpop.permute.xlu1 %801  ;;  %v842_v23 = vpop.permute.xlu0 %841  ;;  %v941_v32 = vrot.slane %v940_v16, 2  ;;  %v893_v22 = vadd.f32 %v892_v43, %v891_v2 }
 0x35c   :  { %v871_v44 = vmul.f32 %v1182_v7, %v842_v23  ;;  %v863_v45 = vmul.f32 %v1184_v47, %v802_v51  ;;  %v897_v51 = vrot.slane %v896_v61, 4 }
 0x35d   :  { %v942_v59 = vadd.f32 %v941_v32, %v940_v16 }
 0x35e   :  { %v959_v26 = vsel %vm58_vm0, %v871_v44, 0.0  ;;  %v903_v15 = vsel %vm58_vm0, %v863_v45, 0.0  ;;  %v898_v39 = vadd.f32 %v897_v51, %v896_v61  ;;  %v1188_v44 = vld [vmem:[#allocation2 + $0x68] sm:$0xff] }
 0x35f   :  { %v960_v57 = vrot.slane %v959_v26, 4  ;;  %v904_v11 = vrot.slane %v903_v15, 4  ;;  %v943_v14 = vrot.slane %v942_v59, 1 }
 0x360   :  { %v899_v46 = vrot.slane %v898_v39, 2 }
 0x361   :  { %v961_v56 = vadd.f32 %v960_v57, %v959_v26  ;;  %v905_v63 = vadd.f32 %v904_v11, %v903_v15  ;;  %v887_v26 = vrot.slane %v886_v13, 1  ;;  %v944_v54 = vadd.f32 %v943_v14, %v942_v59 }
 0x363   :  { %v807_v38 = vpop.permute.xlu1 %806  ;;  %v852_v0 = vpop.permute.xlu0 %851  ;;  %v962_v7 = vrot.slane %v961_v56, 2  ;;  %v906_v52 = vrot.slane %v905_v63, 2  ;;  %v888_v51 = vadd.f32 %v887_v26, %v886_v13 }
 0x364   :  { %v873_v17 = vmul.f32 %v1185_v25, %v852_v0  ;;  %v864_v24 = vmul.f32 %v1186_v21, %v807_v38 }
 0x365   :  { %v963_v16 = vadd.f32 %v962_v7, %v961_v56 }
 0x366   :  { %v973_v28 = vsel %vm58_vm0, %v873_v17, 0.0  ;;  %v910_v6 = vsel %vm58_vm0, %v864_v24, 0.0  ;;  %v920_v24 = vrot.slane %v919_v62, 2 }
 0x367   :  { %v974_v23 = vrot.slane %v973_v28, 4  ;;  %v911_v29 = vrot.slane %v910_v6, 4  ;;  %v964_v35 = vrot.slane %v963_v16, 1 }
 0x368   :  { %v921_v48 = vadd.f32 %v920_v24, %v919_v62 }
 0x369   :  { %v975_v12 = vadd.f32 %v974_v23, %v973_v28  ;;  %v912_v33 = vadd.f32 %v911_v29, %v910_v6 }
 0x36b   :  { %v832_v58 = vpop.permute.xlu1 %831  ;;  %v976_v47 = vrot.slane %v975_v12, 2 }
 0x36c   :  { %v869_v50 = vmul.f32 %v1179_v1, %v832_v58  ;;  %v935_v1 = vadd.f32 %v934_v55, %v933_v40  ;;  %v900_v40 = vadd.f32 %v899_v46, %v898_v39  ;;  %v965_v39 = vadd.f32 %v964_v35, %v963_v16 }
 0x36d   :  { %v977_v4 = vadd.f32 %v976_v47, %v975_v12 }
 0x36e   :  { %v945_v37 = vsel %vm58_vm0, %v869_v50, 0.0  ;;  %v879_v50 = vadd.f32 %v878_v49, %v877_v31  ;;  %v936_v17 = vrot.slane %v935_v1, 1  ;;  %v907_v31 = vadd.f32 %v906_v52, %v905_v63 }
 0x36f   :  { %v946_v18 = vrot.slane %v945_v37, 4  ;;  %v901_v23 = vrot.slane %v900_v40, 1  ;;  %v978_v55 = vrot.slane %v977_v4, 1 }
 0x370   :  { %v937_v28 = vadd.f32 %v936_v17, %v935_v1 }
 0x371   :  { %v947_v20 = vadd.f32 %v946_v18, %v945_v37  ;;  %v913_v18 = vrot.slane %v912_v33, 2  ;;  %v902_v63 = vadd.f32 %v901_v23, %v900_v40 }
 0x372   :  { %v1010_v11 = vsel %vm291_vm2, %v944_v54, %v937_v28 }
 0x373   :  { %v837_v42 = vpop.permute.xlu1 %836  ;;  %v948_v38 = vrot.slane %v947_v20, 2 }
 0x374   :  { %v870_v36 = vmul.f32 %v1187_v60, %v837_v42  ;;  %v914_v42 = vadd.f32 %v913_v18, %v912_v33  ;;  %v985_v60 = vrot.slane %v984_v19, 1 }
 0x375   :  { %v949_v0 = vadd.f32 %v948_v38, %v947_v20  ;;  %v880_v20 = vrot.slane %v879_v50, 1 }
 0x376   :  { %v952_v53 = vsel %vm58_vm0, %v870_v36, 0.0  ;;  %v894_v36 = vrot.slane %v893_v22, 1  ;;  %v986_v1 = vadd.f32 %v985_v60, %v984_v19 }
 0x377   :  { %v953_v3 = vrot.slane %v952_v53, 4  ;;  %v950_v45 = vrot.slane %v949_v0, 1 }
 0x378   :  { %v895_v59 = vadd.f32 %v894_v36, %v893_v22 }
 0x379   :  { %v954_v58 = vadd.f32 %v953_v3, %v952_v53  ;;  %v951_v15 = vadd.f32 %v950_v45, %v949_v0  ;;  %v908_v53 = vrot.slane %v907_v31, 1  ;;  %v915_v3 = vrot.slane %v914_v42, 1 }
 0x37b   :  { %v955_v34 = vrot.slane %v954_v58, 2  ;;  %v847_v5 = vpop.permute.xlu1 %846  ;;  %v1011_v49 = vsel %vm293_vm3, %v951_v15, %v1010_v11  ;;  %v909_v33 = vadd.f32 %v908_v53, %v907_v31  ;;  %v916_v43 = vadd.f32 %v915_v3, %v914_v42 }
 0x37c   :  { %v872_v8 = vmul.f32 %v1188_v44, %v847_v5 }
 0x37d   :  { %v956_v37 = vadd.f32 %v955_v34, %v954_v58  ;;  %v881_v58 = vadd.f32 %v880_v20, %v879_v50  ;;  %v979_v34 = vadd.f32 %v978_v55, %v977_v4 }
 0x37e   :  { %v966_v25 = vsel %vm58_vm0, %v872_v8, 0.0  ;;  %v922_v8 = vrot.slane %v921_v48, 1 }
 0x37f   :  { %v957_v41 = vrot.slane %v956_v37, 1  ;;  %v967_v21 = vrot.slane %v966_v25, 4  ;;  %v1003_v30 = vsel %vm291_vm2, %v888_v51, %v881_v58  ;;  %vm1879_vm2 = vmmov %vm1876_vm7 }
 0x380   :  { %v1004_v62 = vsel %vm293_vm3, %v895_v59, %v1003_v30  ;;  %v923_v45 = vadd.f32 %v922_v8, %v921_v48  ;;  %vm1880_vm3 = vmmov %vm1877_vm6 }
 0x381   :  { %v968_v61 = vadd.f32 %v967_v21, %v966_v25  ;;  %v958_v9 = vadd.f32 %v957_v41, %v956_v37  ;;  %v1005_v50 = vsel %vm295_vm4, %v902_v63, %v1004_v62 }
 0x382   :  { %v1006_v37 = vsel %vm297_vm5, %v909_v33, %v1005_v50 }
 0x383   :  { %v969_v57 = vrot.slane %v968_v61, 2  ;;  %v817_v6 = vpop.permute.xlu1 %816  ;;  %v1012_v27 = vsel %vm295_vm4, %v958_v9, %v1011_v49  ;;  %v1007_v52 = vsel %vm1878_vm15, %v916_v43, %v1006_v37 }
 0x384   :  { %v866_v32 = vmul.f32 %v1189_v10, %v817_v6  ;;  %v1013_v5 = vsel %vm297_vm5, %v965_v39, %v1012_v27  ;;  %v1008_v17 = vsel %vm1879_vm2, %v923_v45, %v1007_v52 }
 0x385   :  { %v970_v38 = vadd.f32 %v969_v57, %v968_v61 }
 0x386   :  { %v924_v29 = vsel %vm58_vm0, %v866_v32, 0.0 }
 0x387   :  { %v971_v2 = vrot.slane %v970_v38, 1  ;;  %v925_v56 = vrot.slane %v924_v29, 4 }
 0x389   :  { %v972_v12 = vadd.f32 %v971_v2, %v970_v38  ;;  %v926_v0 = vadd.f32 %v925_v56, %v924_v29 }
 0x38b   :  { %v1014_v7 = vsel %vm1875_vm10, %v972_v12, %v1013_v5  ;;  %v927_v44 = vrot.slane %v926_v0, 2 }
 0x38c   :  { %v1015_v13 = vsel %vm1876_vm7, %v979_v34, %v1014_v7 }
 0x38d   :  { %v928_v14 = vadd.f32 %v927_v44, %v926_v0  ;;  %v1016_v46 = vsel %vm1877_vm6, %v986_v1, %v1015_v13 }
 0x38e   :  { %1020 = vst.msk [vmem:[#allocation5 + $0x8] sm:$0xff] %vm58_vm0, %v1016_v46 }
 0x38f   :  { %v929_v47 = vrot.slane %v928_v14, 1 }
 0x391   :  { %v930_v25 = vadd.f32 %v929_v47, %v928_v14 }
 0x393   :  { %v1009_v18 = vsel %vm1880_vm3, %v930_v25, %v1008_v17 }
 0x394   :  { %1019 = vst.msk [vmem:[#allocation5] sm:$0xff] %vm58_vm0, %v1009_v18 }
 0x395   :  { %1033 = dma.vmem_to_hbm [thread:$0]  %s1026_s3, 256, %s1028_s8, [#allocation4], %s1243_s20, %s1243_s20, %s1244_s21  }
 0x396   :  { %1240 = dma.done.wait [#allocation4], 256  }
 0x397   :  { %1241 = vsyncadd [#allocation4], 4294967040 }
 0x398   :  { %1038 = vsyncpa [#allocation3], 1 }
 0x399   :  { %1039 = vsyncpa [#allocation4], 1 }

</bundles_post_ra>
